<compile_context>
chip_gen: v7x
topology: tpu7x:2x2x1
jax: 0.10.0
libtpu: 0.0.40
codegen_flags: <defaults>
</compile_context>

<pallas_src>
import jax
import jax.numpy as jnp
from jax.experimental import pallas as pl
from jax.experimental.pallas import tpu as pltpu


def squeeze_axis2(x):
    """torch.squeeze(x, 2) — the production path on all TPU generations.

    Squeezing a size-1 axis is a metadata-only view change (no kernel, no HBM
    traffic).  Matches torch.squeeze semantics: no-op if dim 2 is not size 1.
    """
    if x.ndim < 3 or x.shape[2] != 1:
        return x
    return jnp.squeeze(x, axis=2)


def _make_squeeze_dma_kernel(ndim):
    """Kernel factory: one HBM->HBM DMA that drops the size-1 axis 2."""
    # Static index: full slices everywhere, integer 0 on axis 2 — the source
    # view is contiguous and shape-matches the (axis-2-squeezed) destination.
    src_idx = tuple(0 if d == 2 else slice(None) for d in range(ndim))

    def kernel(x_hbm, o_hbm, sem):
        cp = pltpu.make_async_copy(x_hbm.at[src_idx], o_hbm, sem)
        cp.start()
        cp.wait()

    return kernel


def squeeze_axis2_pallas(x):
    """torch.squeeze(x, 2) as a Pallas kernel that materializes a fresh copy.

    Only use this when an explicit copy is required (e.g. decoupling from a
    donated/aliased buffer).  Otherwise call `squeeze_axis2` — it is free.

    Design: no grid, no VMEM staging.  Both operands are raw HBM refs
    (`memory_space=pl.ANY`) and the kernel issues a single contiguous
    HBM->HBM async DMA, so the cost is exactly 2*N bytes of HBM traffic at
    roofline bandwidth on v5e / v6e / v7x, with zero VMEM footprint.
    """
    if x.ndim < 3 or x.shape[2] != 1:
        return x
    if x.size == 0:
        # Nothing to copy; the view-only squeeze is exact.
        return jnp.squeeze(x, axis=2)

    out_shape = x.shape[:2] + x.shape[3:]
    itemsize = jnp.dtype(x.dtype).itemsize

    return pl.pallas_call(
        _make_squeeze_dma_kernel(x.ndim),
        out_shape=jax.ShapeDtypeStruct(out_shape, x.dtype),
        in_specs=[pl.BlockSpec(memory_space=pl.ANY)],
        out_specs=pl.BlockSpec(memory_space=pl.ANY),
        scratch_shapes=[pltpu.SemaphoreType.DMA(())],
        cost_estimate=pl.CostEstimate(
            flops=0,
            transcendentals=0,
            bytes_accessed=2 * x.size * itemsize,
        ),
    )(x)


if __name__ == "__main__":
    key = jax.random.PRNGKey(0)
    # Small shape with a size-1 axis at position 2, consistent with the module.
    x = jax.random.normal(key, (2, 4, 1, 16), dtype=jnp.float32)

    ref = jnp.squeeze(x, axis=2)

    # Production path — metadata-only squeeze.
    y_fast = jax.block_until_ready(squeeze_axis2(x))
    assert y_fast.shape == (2, 4, 16), y_fast.shape
    assert y_fast.dtype == x.dtype
    assert bool(jnp.array_equal(y_fast, ref)), "fast path mismatch"

    # Explicit-copy path — single HBM->HBM DMA Pallas kernel.
    y_kernel = jax.block_until_ready(squeeze_axis2_pallas(x))
    assert y_kernel.shape == (2, 4, 16), y_kernel.shape
    assert y_kernel.dtype == x.dtype
    assert bool(jnp.array_equal(y_kernel, ref)), "pallas path mismatch"

    # torch.squeeze no-op semantics when dim 2 != 1.
    x_noop = jax.random.normal(key, (2, 4, 3, 16), dtype=jnp.float32)
    y_noop = jax.block_until_ready(squeeze_axis2(x_noop))
    assert y_noop.shape == x_noop.shape
    y_noop_p = jax.block_until_ready(squeeze_axis2_pallas(x_noop))
    assert y_noop_p.shape == x_noop.shape

    print("KERNEL_OK")
</pallas_src>

<mosaic_0001>
module attributes {stable_mosaic.version = 11 : i64} {
  func.func @kernel(%arg0: memref<2x4x1x16xf32, #tpu.memory_space<any>>, %arg1: memref<2x4x16xf32, #tpu.memory_space<any>>, %arg2: memref<!tpu.dma_semaphore, #tpu.memory_space<semaphore_mem>>) attributes {dimension_semantics = [], scalar_prefetch = 0 : i64, scratch_operands = 1 : i64, tpu.core_type = #tpu.core_type<tc>} {
    %c0_i32 = arith.constant 0 : i32
    %c0_i32_0 = arith.constant 0 : i32
    %c0_i32_1 = arith.constant 0 : i32
    %c0_i32_2 = arith.constant 0 : i32
    %0 = tpu.memref_slice %arg0[%c0_i32_0, %c0_i32_1, %c0_i32, %c0_i32_2] : memref<2x4x1x16xf32, #tpu.memory_space<any>> -> memref<2x4x1x16xf32, #tpu.memory_space<any>>
    %1 = tpu.memref_squeeze %0 : memref<2x4x1x16xf32, #tpu.memory_space<any>> -> memref<2x4x16xf32, #tpu.memory_space<any>>
    tpu.enqueue_dma source(%1 : memref<2x4x16xf32, #tpu.memory_space<any>>) target(%arg1 : memref<2x4x16xf32, #tpu.memory_space<any>>) target_semaphore(%arg2 : memref<!tpu.dma_semaphore, #tpu.memory_space<semaphore_mem>>)
    %c0_i32_3 = arith.constant 0 : i32
    %c0_i32_4 = arith.constant 0 : i32
    %c0_i32_5 = arith.constant 0 : i32
    %c0_i32_6 = arith.constant 0 : i32
    %2 = tpu.memref_slice %arg0[%c0_i32_4, %c0_i32_5, %c0_i32_3, %c0_i32_6] : memref<2x4x1x16xf32, #tpu.memory_space<any>> -> memref<2x4x1x16xf32, #tpu.memory_space<any>>
    %3 = tpu.memref_squeeze %2 : memref<2x4x1x16xf32, #tpu.memory_space<any>> -> memref<2x4x16xf32, #tpu.memory_space<any>>
    tpu.wait_dma2 semaphore(%arg2 : memref<!tpu.dma_semaphore, #tpu.memory_space<semaphore_mem>>) src(%3 : memref<2x4x16xf32, #tpu.memory_space<any>>) dst(%arg1 : memref<2x4x16xf32, #tpu.memory_space<any>>)
    return
  }
}

</mosaic_0001>

<bundles_post_ra>
// kernel: tpu_custom_call.1
= control target key start
LH: loop header
LB: loop body
LE: loop exit
PB: predicated region body
PF: predicated region fallthrough
CT: control target
= control target key end

     0   :  { %s35_s6 = smov [#allocation2]   ;;  %s36_s7 = smov [#allocation3]   ;;  %s54_s0 = inlined_call_operand.hbm [shape: f32[2,4,1,16], index: 0, kind: input, shape index: {}]   ;;  %s55_s1 = inlined_call_operand.hbm [shape: f32[2,4,16], index: 1, kind: output, shape index: {}]  }
   0x1   :  { %s37_s8 = smov 0  }
   0x2   :  { %18 = dma.general %s54_s0, 128, %s55_s1, %s35_s6, %s36_s7, [#allocation4], %s37_s8, 0  }
   0x3   :  { %33 = dma.done.wait [#allocation2], 128 }
   0x4   :  { %34 = vsyncadd [#allocation2], 4294967168 }
   0x5   :  { %23 = vsyncmov [#allocation2] }
   0x8   :  { %s24_s13 = vpop.sfrf %23 }
   0x9   :  { %p29_p0 = scmp.ne.s32.totalorder %s24_s13, 0 }
   0xb   :  { %28 = shalt.err (%p29_p0)  }

</bundles_post_ra>
